<compile_context>
chip_gen: v7x
topology: tpu7x:2x2x1
jax: 0.10.0
libtpu: 0.0.40
codegen_flags: <defaults>
</compile_context>

<pallas_src>
import functools

import jax
import jax.numpy as jnp
from jax.experimental import pallas as pl
from jax.experimental.pallas import tpu as pltpu


def _round_up(x, m):
    return ((x + m - 1) // m) * m


def _pick_tile_b(B, requested=None):
    """Pick the batch tile for a batch already padded to a multiple of 8.

    Largest tile (<=1024, multiple of 8) dividing B that still leaves >= 4 grid
    steps (2 per v7x TensorCore, so each core keeps double-buffering its x
    tile). For tiny batches fall back to the smallest divisor to maximize steps.
    """
    if requested is not None:
        assert B % requested == 0, "padded batch must be a multiple of tile_b"
        return requested
    candidates = [t for t in (1024, 512, 256, 128, 64, 32, 16, 8) if B % t == 0]
    # B is padded to a multiple of 8 by the caller, so `candidates` is non-empty.
    for t in candidates:
        if B // t >= 4:
            return t
    return candidates[-1]


def mlp_kernel(x_ref, w1_ref, b1_ref, w2_ref, b2_ref, o_ref, *, approx_recip):
    mm_dtype = w1_ref.dtype  # bf16 (default) or f32 matmul operands

    # hidden = relu(x @ W1 + b1): MXU matmul, f32 accumulation, f32 epilogue
    # (v5e VPU/EUP have no bf16 path).
    x = x_ref[...].astype(mm_dtype)
    h = jnp.dot(x, w1_ref[...], preferred_element_type=jnp.float32)
    h = jnp.maximum(h + b1_ref[...].astype(jnp.float32), 0.0)

    # out = sigmoid(h @ W2 + b2)
    y = jnp.dot(h.astype(mm_dtype), w2_ref[...], preferred_element_type=jnp.float32)
    y = y + b2_ref[...].astype(jnp.float32)

    # sigmoid(y) = 1 / (1 + exp(-y)): exp and reciprocal both run on the EUP
    # slot, keeping the divide off the VALU path.
    t = jnp.exp(-y)
    o_ref[...] = pl.reciprocal(1.0 + t, approx=approx_recip).astype(o_ref.dtype)


def mlp_forward(x, w1, b1, w2, b2, *, tile_b=None, matmul_dtype=jnp.bfloat16,
                approx_sigmoid=None):
    B, D_in = x.shape
    H = w1.shape[1]
    D_out = w2.shape[1]

    if approx_sigmoid is None:
        # Approx EUP reciprocal only on the (already lossy) bf16 path.
        approx_sigmoid = matmul_dtype != jnp.float32

    # --- Lane-align H and D_out (pad to multiples of 128). Zero columns of W1 /
    # zero rows of W2 / zero bias entries are numerically inert; padded output
    # lanes are sliced off below. Keeps both matmuls on unmasked (8,128) tiles
    # and the store a full-lane vst.
    H_pad = _round_up(H, 128)
    D_pad = _round_up(D_out, 128)
    if H_pad != H:
        w1 = jnp.zeros((D_in, H_pad), w1.dtype).at[:, :H].set(w1)
        b1 = jnp.zeros((1, H_pad), b1.dtype).at[:, :H].set(b1)
        w2 = jnp.zeros((H_pad, D_out), w2.dtype).at[:H, :].set(w2)
    if D_pad != D_out:
        w2 = jnp.zeros((H_pad, D_pad), w2.dtype).at[:, :D_out].set(w2)
        b2 = jnp.zeros((1, D_pad), b2.dtype).at[:, :D_out].set(b2)

    # --- Pad batch to a multiple of 8 so a tile always exists (never tile == B
    # for awkward batch sizes); padded rows are sliced off below.
    B_pad = _round_up(B, 8)
    if B_pad != B:
        x = jnp.zeros((B_pad, D_in), x.dtype).at[:B, :].set(x)

    # Matmul operands in bf16 (MXU-native) by default; biases stay f32.
    w1c = w1.astype(matmul_dtype)
    w2c = w2.astype(matmul_dtype)
    b1c = b1.astype(jnp.float32)
    b2c = b2.astype(jnp.float32)

    tb = _pick_tile_b(B_pad, tile_b)
    grid = (B_pad // tb,)

    # VMEM budget: weights/biases single-buffered (Buffered(1)), x/out tiles
    # double-buffered by the default pipeline. Cap at 48 MiB (safe headroom on
    # v7x's 64 MiB physical VMEM), floor at the 32 MiB default scope.
    w_bytes = jnp.dtype(matmul_dtype).itemsize
    x_bytes = jnp.dtype(x.dtype).itemsize
    need = ((D_in * H_pad + H_pad * D_pad) * w_bytes   # W1, W2 (single-buffered)
            + (H_pad + D_pad) * 4                       # b1, b2 f32 (single-buffered)
            + 2 * tb * D_in * x_bytes                   # x tile (double-buffered)
            + 2 * tb * D_pad * x_bytes)                 # out tile (double-buffered)
    vmem_limit = int(min(48 * 2**20, max(32 * 2**20, 2 * need)))

    cost = pl.CostEstimate(
        flops=2 * B_pad * (D_in * H_pad + H_pad * D_pad),
        transcendentals=2 * B_pad * D_pad,  # exp + reciprocal
        bytes_accessed=(B_pad * D_in * x_bytes
                        + (D_in * H_pad + H_pad * D_pad) * w_bytes
                        + (H_pad + D_pad) * 4
                        + B_pad * D_pad * x_bytes),
    )

    kernel = functools.partial(mlp_kernel, approx_recip=approx_sigmoid)

    out = pl.pallas_call(
        kernel,
        out_shape=jax.ShapeDtypeStruct((B_pad, D_pad), x.dtype),
        grid_spec=pltpu.PrefetchScalarGridSpec(
            num_scalar_prefetch=0,
            grid=grid,
            in_specs=[
                # x tile: streamed, double-buffered.
                pl.BlockSpec((tb, D_in), lambda i: (i, 0)),
                # Grid-invariant weights/biases: single-buffer (index_map is
                # constant, double-buffering buys nothing and doubles VMEM).
                pl.BlockSpec((D_in, H_pad), lambda i: (0, 0),
                             pipeline_mode=pl.Buffered(1)),
                pl.BlockSpec((1, H_pad), lambda i: (0, 0),
                             pipeline_mode=pl.Buffered(1)),
                pl.BlockSpec((H_pad, D_pad), lambda i: (0, 0),
                             pipeline_mode=pl.Buffered(1)),
                pl.BlockSpec((1, D_pad), lambda i: (0, 0),
                             pipeline_mode=pl.Buffered(1)),
            ],
            out_specs=pl.BlockSpec((tb, D_pad), lambda i: (i, 0)),
        ),
        compiler_params=pltpu.CompilerParams(
            dimension_semantics=("parallel",),
            vmem_limit_bytes=vmem_limit,
        ),
        cost_estimate=cost,
    )(x, w1c, b1c, w2c, b2c)

    if B_pad != B or D_pad != D_out:
        out = out[:B, :D_out]
    return out


def init_params(key, input_dim, hidden_dim, output_dim, dtype=jnp.float32):
    # Deterministic init mimicking nn.Linear's U(-1/sqrt(fan_in), 1/sqrt(fan_in)).
    k1, k2, k3, k4 = jax.random.split(key, 4)
    lim1 = 1.0 / (input_dim ** 0.5)
    lim2 = 1.0 / (hidden_dim ** 0.5)
    w1 = jax.random.uniform(k1, (input_dim, hidden_dim), dtype, -lim1, lim1)
    b1 = jax.random.uniform(k2, (1, hidden_dim), dtype, -lim1, lim1)
    w2 = jax.random.uniform(k3, (hidden_dim, output_dim), dtype, -lim2, lim2)
    b2 = jax.random.uniform(k4, (1, output_dim), dtype, -lim2, lim2)
    return w1, b1, w2, b2


def mlp_reference(x, w1, b1, w2, b2):
    h = jnp.maximum(x @ w1 + b1, 0.0)
    return jax.nn.sigmoid(h @ w2 + b2)


if __name__ == "__main__":
    input_dim, hidden_dim, output_dim = 16, 32, 8
    batch = 16

    key = jax.random.PRNGKey(0)
    kx, kp = jax.random.split(key)
    x = jax.random.normal(kx, (batch, input_dim), jnp.float32)
    w1, b1, w2, b2 = init_params(kp, input_dim, hidden_dim, output_dim)
    ref = mlp_reference(x, w1, b1, w2, b2)

    # 1) Full-precision matmul path (exact sigmoid): tight tolerance.
    out_f32 = jax.block_until_ready(
        mlp_forward(x, w1, b1, w2, b2, matmul_dtype=jnp.float32))
    assert out_f32.shape == (batch, output_dim)
    assert jnp.allclose(out_f32, ref, atol=1e-5, rtol=1e-5)

    # 2) Default bf16-MXU path (f32 accumulation, approx EUP reciprocal).
    out_bf16 = jax.block_until_ready(mlp_forward(x, w1, b1, w2, b2))
    assert out_bf16.shape == (batch, output_dim)
    assert jnp.allclose(out_bf16, ref, atol=2e-2, rtol=2e-2)

    # 3) Larger batch exercising the >=4-step tile heuristic (tb=128, 4 steps).
    big_b = 512
    xb = jax.random.normal(kx, (big_b, input_dim), jnp.float32)
    out_big = jax.block_until_ready(mlp_forward(xb, w1, b1, w2, b2))
    assert out_big.shape == (big_b, output_dim)
    assert jnp.allclose(out_big, mlp_reference(xb, w1, b1, w2, b2),
                        atol=2e-2, rtol=2e-2)

    # 4) Ragged batch (not a multiple of 8) exercising the batch-padding path.
    odd_b = 13
    xo = jax.random.normal(kx, (odd_b, input_dim), jnp.float32)
    out_odd = jax.block_until_ready(mlp_forward(xo, w1, b1, w2, b2))
    assert out_odd.shape == (odd_b, output_dim)
    assert jnp.allclose(out_odd, mlp_reference(xo, w1, b1, w2, b2),
                        atol=2e-2, rtol=2e-2)

    # 5) bf16 activations in/out (upstream produces bf16): no wrapper casts.
    xbf = x.astype(jnp.bfloat16)
    out_act_bf16 = jax.block_until_ready(mlp_forward(xbf, w1, b1, w2, b2))
    assert out_act_bf16.dtype == jnp.bfloat16
    assert jnp.allclose(out_act_bf16.astype(jnp.float32), ref,
                        atol=5e-2, rtol=5e-2)

    print("KERNEL_OK")
</pallas_src>

<mosaic_0001>
module attributes {stable_mosaic.version = 11 : i64} {
  func.func @mlp_kernel(%arg0: i32, %arg1: memref<8x16xf32, #tpu.memory_space<vmem>>, %arg2: memref<16x128xf32, #tpu.memory_space<vmem>>, %arg3: memref<1x128xf32, #tpu.memory_space<vmem>>, %arg4: memref<128x128xf32, #tpu.memory_space<vmem>>, %arg5: memref<1x128xf32, #tpu.memory_space<vmem>>, %arg6: memref<8x128xf32, #tpu.memory_space<vmem>>) attributes {dimension_semantics = [#tpu.dimension_semantics<parallel>], iteration_bounds = array<i64: 2>, scalar_prefetch = 0 : i64, scratch_operands = 0 : i64, tpu.core_type = #tpu.core_type<tc>, window_params = [{transform_indices = @transform_0, window_bounds = array<i64: 8, 16>}, {pipeline_mode = #tpu.pipeline_mode<synchronous>, transform_indices = @transform_1, window_bounds = array<i64: 16, 128>}, {pipeline_mode = #tpu.pipeline_mode<synchronous>, transform_indices = @transform_2, window_bounds = array<i64: 1, 128>}, {pipeline_mode = #tpu.pipeline_mode<synchronous>, transform_indices = @transform_3, window_bounds = array<i64: 128, 128>}, {pipeline_mode = #tpu.pipeline_mode<synchronous>, transform_indices = @transform_4, window_bounds = array<i64: 1, 128>}, {transform_indices = @transform_5, window_bounds = array<i64: 8, 128>}]} {
    %c0 = arith.constant 0 : index
    %c0_0 = arith.constant 0 : index
    %0 = vector.load %arg1[%c0, %c0_0] : memref<8x16xf32, #tpu.memory_space<vmem>>, vector<8x16xf32>
    %c0_1 = arith.constant 0 : index
    %c0_2 = arith.constant 0 : index
    %1 = vector.load %arg2[%c0_1, %c0_2] : memref<16x128xf32, #tpu.memory_space<vmem>>, vector<16x128xf32>
    %cst = arith.constant dense<0.000000e+00> : vector<8x128xf32>
    %2 = tpu.matmul %0, %1, %cst {dimension_numbers = #tpu.dot_dimension_numbers<[1], [0], [0], [1], [0, 0, 1, 1], [], []>} : vector<8x16xf32>, vector<16x128xf32>, vector<8x128xf32> -> vector<8x128xf32>
    %c0_3 = arith.constant 0 : index
    %c0_4 = arith.constant 0 : index
    %3 = vector.load %arg3[%c0_3, %c0_4] : memref<1x128xf32, #tpu.memory_space<vmem>>, vector<1x128xf32>
    %4 = vector.broadcast %3 : vector<1x128xf32> to vector<8x128xf32>
    %5 = arith.addf %2, %4 : vector<8x128xf32>
    %cst_5 = arith.constant 0.000000e+00 : f32
    %6 = vector.broadcast %cst_5 : f32 to vector<8x128xf32>
    %7 = arith.maximumf %5, %6 : vector<8x128xf32>
    %c0_6 = arith.constant 0 : index
    %c0_7 = arith.constant 0 : index
    %8 = vector.load %arg4[%c0_6, %c0_7] : memref<128x128xf32, #tpu.memory_space<vmem>>, vector<128x128xf32>
    %cst_8 = arith.constant dense<0.000000e+00> : vector<8x128xf32>
    %9 = tpu.matmul %7, %8, %cst_8 {dimension_numbers = #tpu.dot_dimension_numbers<[1], [0], [0], [1], [0, 0, 1, 1], [], []>} : vector<8x128xf32>, vector<128x128xf32>, vector<8x128xf32> -> vector<8x128xf32>
    %c0_9 = arith.constant 0 : index
    %c0_10 = arith.constant 0 : index
    %10 = vector.load %arg5[%c0_9, %c0_10] : memref<1x128xf32, #tpu.memory_space<vmem>>, vector<1x128xf32>
    %11 = vector.broadcast %10 : vector<1x128xf32> to vector<8x128xf32>
    %12 = arith.addf %9, %11 : vector<8x128xf32>
    %cst_11 = arith.constant 0.000000e+00 : f32
    %13 = vector.broadcast %cst_11 : f32 to vector<8x128xf32>
    %14 = arith.subf %13, %12 : vector<8x128xf32>
    %15 = math.exp %14 : vector<8x128xf32>
    %cst_12 = arith.constant 1.000000e+00 : f32
    %16 = vector.broadcast %cst_12 : f32 to vector<8x128xf32>
    %17 = arith.addf %16, %15 : vector<8x128xf32>
    %18 = tpu.reciprocal %17 : vector<8x128xf32> -> vector<8x128xf32>
    %c0_13 = arith.constant 0 : index
    %c0_14 = arith.constant 0 : index
    %19 = vector.load %arg6[%c0_13, %c0_14] : memref<8x128xf32, #tpu.memory_space<vmem>>, vector<8x128xf32>
    tpu.vector_store %arg6[%c0_13, %c0_14], %18 {strides = array<i32>} : memref<8x128xf32, #tpu.memory_space<vmem>>, vector<8x128xf32>,
    return
  }
  func.func @transform_0(%arg0: i32) -> (i32, i32) {
    %c0_i32 = arith.constant 0 : i32
    %c0_i32_0 = arith.constant 0 : i32
    return %arg0, %c0_i32 : i32, i32
  }
  func.func @transform_1(%arg0: i32) -> (i32, i32) {
    %c0_i32 = arith.constant 0 : i32
    %c0_i32_0 = arith.constant 0 : i32
    %c0_i32_1 = arith.constant 0 : i32
    return %c0_i32, %c0_i32_0 : i32, i32
  }
  func.func @transform_2(%arg0: i32) -> (i32, i32) {
    %c0_i32 = arith.constant 0 : i32
    %c0_i32_0 = arith.constant 0 : i32
    %c0_i32_1 = arith.constant 0 : i32
    return %c0_i32, %c0_i32_0 : i32, i32
  }
  func.func @transform_3(%arg0: i32) -> (i32, i32) {
    %c0_i32 = arith.constant 0 : i32
    %c0_i32_0 = arith.constant 0 : i32
    %c0_i32_1 = arith.constant 0 : i32
    return %c0_i32, %c0_i32_0 : i32, i32
  }
  func.func @transform_4(%arg0: i32) -> (i32, i32) {
    %c0_i32 = arith.constant 0 : i32
    %c0_i32_0 = arith.constant 0 : i32
    %c0_i32_1 = arith.constant 0 : i32
    return %c0_i32, %c0_i32_0 : i32, i32
  }
  func.func @transform_5(%arg0: i32) -> (i32, i32) {
    %c0_i32 = arith.constant 0 : i32
    %c0_i32_0 = arith.constant 0 : i32
    return %arg0, %c0_i32 : i32, i32
  }
}

</mosaic_0001>

<bundles_post_ra>
// kernel: tpu_custom_call.1
= control target key start
LH: loop header
LB: loop body
LE: loop exit
PB: predicated region body
PF: predicated region fallthrough
CT: control target
= control target key end

     0   :  { %10 = vsyncpa [#allocation3], 0  ;;  %s1176_s0 = inlined_call_operand.hbm [shape: f32[16,16], index: 0, kind: input, shape index: {}]   ;;  %s1177_s1 = inlined_call_operand.hbm [shape: f32[16,128], index: 1, kind: input, shape index: {}]   ;;  %s1178_s2 = inlined_call_operand.vmem [shape: f32[1,128], index: 2, kind: input, shape index: {}]   ;;  %s1179_s3 = inlined_call_operand.hbm [shape: f32[128,128], index: 3, kind: input, shape index: {}]   ;;  %s1180_s4 = inlined_call_operand.vmem [shape: f32[1,128], index: 4, kind: input, shape index: {}]   ;;  %s1181_s5 = inlined_call_operand.hbm [shape: f32[16,128], index: 5, kind: output, shape index: {}]  }
   0x1   :  { %12 = vsyncpa [#allocation3 + $0x1], 0 }
   0x2   :  { %13 = vsyncpa [#allocation6], 0 }
   0x3   :  { %14 = vsyncpa [#allocation4], 0 }
   0x4   :  { %16 = vsyncpa [#allocation4 + $0x1], 0  ;;  %s937_s18 = smov 0   ;;  %s939_s19 = smov 0  }
   0x5   :  { %s941_s20 = smov 0   ;;  %s943_s21 = smov 0  }
   0x6 LB: > { %s958_s22 = sadd.s32 4294967295, %s896_s21   ;;  %s556_s23 = sadd.s32 4294967294, %s896_s21   ;;  %s896_s21 = sphi %s943_s21, %s1201_s21   ;;  %s892_s20 = sphi %s941_s20, %s1200_s20   ;;  %s888_s19 = sphi %s939_s19, %s1199_s19   ;;  %s884_s18 = sphi %s937_s18, %s1198_s18  }
   0x7   : > { %p42_p0 = scmp.ne.s32.totalorder %s888_s19, %s884_s18  ;;  %p1182_p1 = scmp.eq.s32.totalorder %s958_s22, 0 }
   0x8   : > { %p156_p3 = scmp.eq.s32.totalorder %s556_s23, 1  ;;  %p557_p5 = scmp.ge.s32.totalorder %s896_s21, 1 }
   0x9   : > { %p967_p4 = por %p1182_p1, %p42_p0  ;;  %p163_p7 = scmp.lt.s32.totalorder %s896_s21, 3 }
   0xa   : > { %p972_p6 = por %p156_p3, %p42_p0  ;;  %s898_s27 = smov [#allocation5]  }
   0xb   : > { %s1185_s24 = scalar_select %p967_p4, 1, 0 }
   0xc   : > { %s1186_s25 = scalar_select %p972_p6, 1, 0 }
   0xd   : > { %p977_p8 = pnand %p557_p5, %p163_p7  ;;  %s175_s28 = sshll.u32 %s898_s27, 4  ;;  %s981_s28 = int_to_ptr.vmem [resolvable:$true] %s175_s28 }
   0xe   : > { %s899_s30 = smov [#allocation7]   ;;  %s740_s9 = scalar_lea.hbm %s1177_s1, 256 }
   0xf   : > { %p676_p9 = pneg %p977_p8  ;;  %s191_s6 = sshll.u32 %s899_s30, 4  ;;  %s992_s6 = int_to_ptr.vmem [resolvable:$true] %s191_s6 }
  0x10   : > { %p741_p12 = scmp.ne.s32.totalorder %s1177_s1, %s740_s9  ;;  %p747_p5 = scmp.lt.u32.totalorder %s740_s9, %s1177_s1 }
  0x11   : > { %p988_p11 = pnand %p676_p9, %p1182_p1 }
  0x13   : > { %p742_p13 = pneg %p988_p11 }
  0x15   : > { %p743_p0 = pnand %p742_p13, %p741_p12 }
  0x17   : > { %p744_p3 = pneg %p743_p0 }
  0x19   : > { %p749_p7 = pnand %p747_p5, %p744_p3 }
  0x1b   : > { %752 = shalt.err (!%p749_p7)
}
  0x1c   : > { %s753_s14 = scalar_lea.vmem %s981_s28, 256  ;;  %p761_p2 = scmp.lt.s32.totalorder %s981_s28, %s981_s28 }
  0x1d   : > { %p754_p9 = scmp.ne.s32.totalorder %s981_s28, %s753_s14  ;;  %p762_p12 = scmp.lt.s32.totalorder %s753_s14, %s753_s14 }
  0x1f   : > { %p756_p10 = pnand %p754_p9, %p742_p13  ;;  %p763_p0 = por %p762_p12, %p761_p2 }
  0x21   : > { %p757_p1 = pneg %p756_p10 }
  0x23   : > { %p764_p6 = pnand %p763_p0, %p757_p1 }
  0x25   : > { %767 = shalt.err (!%p764_p6)
}
  0x26   : > { %s900_s15 = smov 128   ;;  %s901_s16 = smov 8  }
  0x27   : > { %679 = dma.hbm_to_vmem [thread:$0]  (!%p988_p11), %s1177_s1, 256, %s981_s28, [#allocation6], %s900_s15, %s900_s15, %s901_s16  }
  0x28   : > { %s768_s7 = scalar_lea.hbm %s1179_s3, 2048 }
  0x29   : > { %p769_p2 = scmp.ne.s32.totalorder %s1179_s3, %s768_s7  ;;  %p775_p10 = scmp.lt.u32.totalorder %s768_s7, %s1179_s3 }
  0x2b   : > { %p771_p1 = pnand %p769_p2, %p742_p13 }
  0x2d   : > { %p772_p6 = pneg %p771_p1 }
  0x2f   : > { %p777_p3 = pnand %p775_p10, %p772_p6 }
  0x31   : > { %780 = shalt.err (!%p777_p3)
}
  0x32   : > { %s781_s28 = scalar_lea.vmem %s992_s6, 2048  ;;  %p789_p12 = scmp.lt.s32.totalorder %s992_s6, %s992_s6 }
  0x33   : > { %p782_p5 = scmp.ne.s32.totalorder %s992_s6, %s781_s28  ;;  %p790_p0 = scmp.lt.s32.totalorder %s781_s28, %s781_s28 }
  0x35   : > { %p784_p7 = pnand %p782_p5, %p742_p13  ;;  %p791_p2 = por %p790_p0, %p789_p12 }
  0x37   : > { %p785_p9 = pneg %p784_p7 }
  0x39   : > { %p792_p1 = pnand %p791_p2, %p785_p9 }
  0x3b   : > { %795 = shalt.err (!%p792_p1)
}
  0x3c   : > { %682 = dma.hbm_to_vmem [thread:$0]  (!%p988_p11), %s1179_s3, 2048, %s992_s6, [#allocation6], %s900_s15, %s900_s15, %s901_s16  }
  0x3d   : > { %s1047_s14 = sadd.s32 1, %s896_s21   ;;  %s29_s29 = sadd.s32 1, %s892_s20 }
  0x3e   : > { %s26_s17 = ssub.s32 %s896_s21, %s1047_s14  ;;  %p36_p13 = scmp.ne.s32.totalorder %s892_s20, %s888_s19 }
  0x3f   : > { %p27_p6 = scmp.eq.s32.totalorder %s26_s17, 0  ;;  %p37_p10 = scmp.eq.s32.totalorder %s896_s21, 0 }
  0x40   : > { %p1189_p3 = scmp.eq.s32.totalorder %s958_s22, 1  ;;  %p693_p7 = scmp.lt.s32.totalorder %s896_s21, 2 }
  0x41   : > { %s1063_s27 = scalar_select %p27_p6, %s892_s20, %s29_s29  }
  0x42   : > { %p1057_p5 = por %p1189_p3, %p36_p13  ;;  %p38_p9 = por %p37_p10, %p36_p13 }
  0x43   : > { %s208_s30 = sand.u32 1, %s892_s20   ;;  %s562_s6 = sshll.u32 %s896_s21, 7 }
  0x44   : > { %s1190_s23 = scalar_select %p1057_p5, 1, 0 }
  0x45   : > { %s561_s7 = sshll.u32 %s208_s30, 3  ;;  %s1070_s8 = scalar_lea.hbm %s1176_s0, %s562_s6 }
  0x46   : > { %s212_s9 = scalar_lea.vmem [#allocation2], %s561_s7  ;;  %p1074_p11 = pnand %p693_p7, %p38_p9 }
  0x47   : > { %s219_s10 = sshll.u32 %s212_s9, 4  ;;  %s209_s28 = scalar_lea.sflag [#allocation3], %s208_s30  ;;  %s1072_s10 = int_to_ptr.vmem [resolvable:$true] %s219_s10 }
  0x48   : > { %s796_s12 = scalar_lea.hbm %s1070_s8, 128  ;;  %p798_p0 = pneg %p1074_p11 }
  0x49   : > { %p797_p12 = scmp.ne.s32.totalorder %s1070_s8, %s796_s12  ;;  %s801_s17 = scalar_lea.hbm %s1176_s0, 256 }
  0x4a   : > { %p802_p13 = scmp.lt.u32.totalorder %s1070_s8, %s1176_s0  ;;  %p803_p6 = scmp.lt.u32.totalorder %s801_s17, %s796_s12 }
  0x4b   : > { %p799_p2 = pnand %p798_p0, %p797_p12  ;;  %p805_p3 = scmp.lt.u32.totalorder %s796_s12, %s1070_s8 }
  0x4c   : > { %p804_p10 = por %p803_p6, %p802_p13 }
  0x4d   : > { %p800_p1 = pneg %p799_p2 }
  0x4e   : > { %p806_p7 = por %p805_p3, %p804_p10 }
  0x50   : > { %p807_p9 = pnand %p806_p7, %p800_p1 }
  0x52   : > { %810 = shalt.err (!%p807_p9)
}
  0x53   : > { %s811_s30 = scalar_lea.vmem %s1072_s10, 128  ;;  %s902_s15 = smov [#allocation2]  }
  0x54   : > { %p812_p12 = scmp.ne.s32.totalorder %s1072_s10, %s811_s30  ;;  %s816_s16 = sshll.u32 %s902_s15, 4  ;;  %s817_s16 = int_to_ptr.vmem [resolvable:$false] %s816_s16 }
  0x55   : > { %s818_s9 = scalar_lea.vmem %s817_s16, 256  ;;  %p819_p4 = scmp.lt.s32.totalorder %s1072_s10, %s817_s16 }
  0x56   : > { %p814_p2 = pnand %p812_p12, %p798_p0  ;;  %p820_p13 = scmp.lt.s32.totalorder %s818_s9, %s811_s30 }
  0x58   : > { %p815_p5 = pneg %p814_p2  ;;  %p821_p6 = por %p820_p13, %p819_p4 }
  0x5a   : > { %p822_p10 = pnand %p821_p6, %p815_p5 }
  0x5c   : > { %825 = shalt.err (!%p822_p10)
}
  0x5d   : > { %686 = dma.hbm_to_vmem [thread:$0]  (!%p1074_p11), %s1070_s8, 128, %s1072_s10, %s209_s28  }
  0x5e   : > { %228 = sbr.rel (%p977_p8) target bundleno = 583 (0x247), region = 40  ;;  %s1106_s12 = sand.u32 (!%p977_p8), 1, %s888_s19  }
  0x5f   : > { %s564_s13 = sshll.u32 (!%p977_p8), %s1106_s12, 3  ;;  %s231_s29 = scalar_lea.sflag (!%p977_p8), [#allocation3], %s1106_s12 }
  0x60   : > { %s234_s17 = scalar_lea.vmem (!%p977_p8), [#allocation2], %s564_s13  ;;  %p1192_p4 = scmp.ne.s32.totalorder (!%p977_p8), %s1185_s24, 0 }
  0x65   : > { %871 = dma.done.wait (%p1192_p4), %s231_s29, 128  }
  0x66   : > { %873 = vsyncadd (%p1192_p4), %s231_s29, 4294967168  ;;  %p1193_p5 = scmp.eq.s32.totalorder %s958_s22, 0 }
  0x68   : > { %875 = dma.done.wait (%p1193_p5), [#allocation6], 2304   ;;  %p1194_p8 = pmov %p1193_p5 }
  0x69   : > { %v903_v0 = vmov 0.0|0.0   ;;  %vm904_vm0 = vmmov 0   ;;  %v905_v1 = vmov 0.0   ;;  %v270_v2 = vld [vmem:[#allocation5] sm:$0xff]  ;;  %v271_v3 = vld [vmem:[#allocation5 + $0x8] sm:$0xff]  ;;  %v354_v5 = vld [vmem:[#allocation7] sm:$0xff] }
  0x6a   : > { %877 = vsyncadd (%p1194_p8), [#allocation6], 4294964992  ;;  %637 = vmatprep.subr.bf16.mxu0 %v903_v0  ;;  %599 = vmatprep.mubr.msk.f32.mxu0 %vm904_vm0, %v905_v1  ;;  %v638_v4 = vpack.c.bf16 %v271_v3, %v270_v2  ;;  %v355_v6 = vld [vmem:[#allocation7 + $0x8] sm:$0xff]  ;;  %v356_v7 = vld [vmem:[#allocation7 + $0x10] sm:$0xff]  ;;  %vm279_vm1 = vcmask 130048   ;;  %s572_s11 = sshll.u32 %s958_s22, 7 }
  0x6b   : > { %640 = vmatprep.subr.bf16.mxu1 %v903_v0  ;;  %634 = vmatprep.mubr.msk.f32.mxu1 %vm904_vm0, %v905_v1  ;;  %v641_v8 = vpack.c.bf16 %v355_v6, %v354_v5  ;;  %v357_v9 = vld [vmem:[#allocation7 + $0x18] sm:$0xff]  ;;  %v269_v10 = vld [vmem:[%s234_s17] sm:$0xff]  ;;  %v360_v15 = vld [vmem:[#allocation7 + $0x30] sm:$0xff]  ;;  %s268_s28 = scalar_lea.vmem [#allocation8], %s564_s13  ;;  %s1132_s15 = scalar_lea.hbm %s1181_s5, %s572_s11 }
  0x6c   : > { %639 = vmatpush3.bf16.msra.mxu0 %v638_v4  ;;  %v644_v11 = vpack.c.bf16 %v357_v9, %v356_v7  ;;  %v358_v12 = vld [vmem:[#allocation7 + $0x20] sm:$0xff]  ;;  %v359_v13 = vld [vmem:[#allocation7 + $0x28] sm:$0xff]  ;;  %v361_v16 = vld [vmem:[#allocation7 + $0x38] sm:$0xff]  ;;  %s467_s7 = sshll.u32 %s268_s28, 4  ;;  %s454_s16 = scalar_lea.sflag [#allocation4], %s1106_s12  ;;  %s1134_s7 = int_to_ptr.vmem [resolvable:$true] %s467_s7 }
  0x6d   : > { %642 = vmatpush3.bf16.msra.mxu1 %v641_v8  ;;  %v647_v14 = vpack.c.bf16 %v359_v13, %v358_v12  ;;  %v650_v17 = vpack.c.bf16 %v361_v16, %v360_v15  ;;  %v362_v18 = vld [vmem:[#allocation7 + $0x40] sm:$0xff]  ;;  %v363_v19 = vld [vmem:[#allocation7 + $0x48] sm:$0xff]  ;;  %v364_v21 = vld [vmem:[#allocation7 + $0x50] sm:$0xff]  ;;  %s826_s9 = scalar_lea.vmem %s1134_s7, 128  ;;  %p1195_p0 = scmp.ne.s32.totalorder %s1190_s23, 0 }
  0x6e   : > { %643 = vmatprep.subr.bf16.mxu1 %v903_v0  ;;  %v653_v20 = vpack.c.bf16 %v363_v19, %v362_v18  ;;  %v365_v22 = vld [vmem:[#allocation7 + $0x58] sm:$0xff]  ;;  %v366_v24 = vld [vmem:[#allocation7 + $0x60] sm:$0xff]  ;;  %v367_v25 = vld [vmem:[#allocation7 + $0x68] sm:$0xff]  ;;  %p827_p11 = scmp.ne.s32.totalorder %s1134_s7, %s826_s9  ;;  %s906_s22 = smov [#allocation8]  }
  0x6f   : > { %600 = vmatmul.mubr.msk.f32.vlgmr.msra.gmra.mrb[0].mxu0 %vm279_vm1, %v269_v10  ;;  %v656_v23 = vpack.c.bf16 %v365_v22, %v364_v21  ;;  %v659_v26 = vpack.c.bf16 %v367_v25, %v366_v24  ;;  %v368_v27 = vld [vmem:[#allocation7 + $0x70] sm:$0xff]  ;;  %v369_v28 = vld [vmem:[#allocation7 + $0x78] sm:$0xff]  ;;  %v568_v30 = vld [vmem:[%s1178_s2] ss:$0 sm:$0xff]  ;;  %s830_s13 = sshll.u32 %s906_s22, 4  ;;  %s831_s13 = int_to_ptr.vmem [resolvable:$false] %s830_s13 }
  0x70   : > { %v662_v29 = vpack.c.bf16 %v369_v28, %v368_v27  ;;  %v570_v35 = vld [vmem:[%s1180_s4] ss:$0 sm:$0xff]  ;;  %p828_p1 = pnand %p827_p11, %p1195_p0  ;;  %s832_s29 = scalar_lea.vmem %s831_s13, 256 }
  0x71   : > { %645 = vmatpush3.bf16.msra.mxu1 %v644_v11  ;;  %p833_p7 = scmp.lt.s32.totalorder %s1134_s7, %s831_s13  ;;  %p834_p9 = scmp.lt.s32.totalorder %s832_s29, %s826_s9 }
  0x72   : > { %646 = vmatprep.subr.bf16.mxu1 %v903_v0  ;;  %p829_p3 = pneg %p828_p1 }
  0x73   : > { %p835_p12 = por %p834_p9, %p833_p7 }
  0x75   : > { %648 = vmatpush3.bf16.msra.mxu1 %v647_v14  ;;  %p836_p2 = pnand %p835_p12, %p829_p3 }
  0x76   : > { %649 = vmatprep.subr.bf16.mxu1 %v903_v0 }
  0x79   : > { %651 = vmatpush3.bf16.msra.mxu1 %v650_v17 }
  0x7a   : > { %652 = vmatprep.subr.bf16.mxu1 %v903_v0 }
  0x7d   : > { %654 = vmatpush3.bf16.msra.mxu1 %v653_v20 }
  0x7e   : > { %655 = vmatprep.subr.bf16.mxu1 %v903_v0 }
  0x81   : > { %657 = vmatpush3.bf16.msra.mxu1 %v656_v23 }
  0x82   : > { %658 = vmatprep.subr.bf16.mxu1 %v903_v0 }
  0x85   : > { %660 = vmatpush3.bf16.msra.mxu1 %v659_v26 }
  0x86   : > { %661 = vmatprep.subr.bf16.mxu1 %v903_v0 }
  0x89   : > { %663 = vmatpush3.bf16.msra.mxu1 %v662_v29 }
 0x142   : > { %v349_v31 = vpop.f32.mrb[0].mxu0 }
 0x143   : > { %v350_v32 = vadd.f32 %v568_v30, %v349_v31  ;;  %v601_v33 = vpop.f32.mrb[1].mxu0 }
 0x145   : > { %v353_v34 = vmax.f32 %v350_v32, 0.0 }
 0x147   : > { %635 = vmatmul.mubr.f32.vlgmr.msra.gmra.mrb[0].mxu1 %v353_v34 }
 0x21a   : > { %v443_v36 = vpop.f32.mrb[0].mxu1 }
 0x21b   : > { %v444_v37 = vadd.f32 %v570_v35, %v443_v36  ;;  %v636_v38 = vpop.f32.mrb[1].mxu1 }
 0x21d   : > { %v447_v39 = vsub.f32 0.0, %v444_v37 }
 0x21f   : > { %v448_v40 = vmul.f32 1.442695, %v447_v39 }
 0x221   : > { %736 = vpow2.f32 %v448_v40 }
 0x22b   : > { %v737_v41 = vpop.eup %736 }
 0x22c   : > { %v450_v42 = vadd.f32 1.0, %v737_v41 }
 0x22e   : > { %738 = vrcp.f32 %v450_v42 }
 0x238   : > { %v739_v43 = vpop.eup %738 }
 0x239   : > { %452 = vst [vmem:[%s268_s28] sm:$0xff] %v739_v43 }
 0x23a   : > { %839 = shalt.err (!%p836_p2)
}
 0x23b   : > { %s840_s12 = scalar_lea.hbm %s1132_s15, 128  ;;  %s844_s26 = scalar_lea.hbm %s1181_s5, 256 }
 0x23c   : > { %p841_p13 = scmp.ne.s32.totalorder %s1132_s15, %s840_s12  ;;  %p845_p4 = scmp.lt.u32.totalorder %s1132_s15, %s1181_s5 }
 0x23d   : > { %p846_p5 = scmp.lt.u32.totalorder %s844_s26, %s840_s12  ;;  %p848_p11 = scmp.lt.u32.totalorder %s840_s12, %s1132_s15 }
 0x23e   : > { %p842_p6 = pnand %p841_p13, %p1195_p0 }
 0x23f   : > { %p847_p8 = por %p846_p5, %p845_p4 }
 0x240   : > { %p843_p10 = pneg %p842_p6 }
 0x241   : > { %p849_p1 = por %p848_p11, %p847_p8 }
 0x243   : > { %p850_p3 = pnand %p849_p1, %p843_p10 }
 0x245   : > { %853 = shalt.err (!%p850_p3)
}
 0x246   : > { %674 = dma.vmem_to_hbm [thread:$0]  (%p1195_p0), %s1134_s7, 128, %s1132_s15, %s454_s16  }
 0x247 PF: > { %s479_s11 = sand.u32 1, %s884_s18   ;;  %p1196_p7 = scmp.ne.s32.totalorder %s1186_s25, 0 }
 0x248   : > { %p1197_p9 = scmp.ge.s32.totalorder %s896_s21, 2  ;;  %s480_s28 = scalar_lea.sflag [#allocation4], %s479_s11 }
 0x24a   : > { %p688_p12 = pnand %p1197_p9, %p1196_p7 }
 0x24c   : > { %879 = dma.done.wait (!%p688_p12), %s480_s28, 128  }
 0x24d   : > { %881 = vsyncadd (!%p688_p12), %s480_s28, 4294967168  ;;  %p19_p2 = scmp.ge.s32.totalorder %s1047_s14, 4   ;;  %s1198_s18 = smov %s888_s19 }
 0x24e   : > { %s1199_s19 = smov %s892_s20  ;;  %s1200_s20 = smov %s1063_s27 }
 0x24f   : > { %s1201_s21 = smov %s1047_s14  ;;  %21 = sbr.rel (!%p19_p2) target bundleno = 6 (0x6), region = 93 }
 0x256   :  { %485 = vsyncpa [#allocation3], 1 }
 0x257   :  { %487 = vsyncpa [#allocation3 + $0x1], 1 }
 0x258   :  { %488 = vsyncpa [#allocation6], 1 }
 0x259   :  { %489 = vsyncpa [#allocation4], 1 }
 0x25a   :  { %491 = vsyncpa [#allocation4 + $0x1], 1 }

</bundles_post_ra>
